<compile_context>
chip_gen: v6e
topology: v6e:2x2x1
jax: 0.10.0
libtpu: 0.0.40
codegen_flags: <defaults>
</compile_context>

<pallas_src>
import functools

import jax
import jax.numpy as jnp
from jax.experimental import pallas as pl
from jax.experimental.pallas import tpu as pltpu


def _round_up(x, m):
    return (x + m - 1) // m * m


def _mlp_kernel(xt_ref, p_ref, o_ref, *, S, H, C, offs):
    """out^T = W3^T @ relu(W2^T @ relu(W1^T @ x^T + b1) + b2) + b3."""
    o_w1, o_b1, o_w2, o_b2, o_w3, o_b3 = offs

    xt = xt_ref[...]                                 # [S, TB], batch in lanes

    # Static carves out of the single packed-parameter block (8-sublane-
    # aligned row offsets; the block is resident in VMEM across the grid).
    w1t = p_ref[o_w1:o_w1 + H, 0:S]                  # [H, S]
    b1 = p_ref[o_b1:o_b1 + H, 0:1]                   # [H, 1]
    w2t = p_ref[o_w2:o_w2 + H, 0:H]                  # [H, H]
    b2 = p_ref[o_b2:o_b2 + H, 0:1]                   # [H, 1]
    w3t = p_ref[o_w3:o_w3 + C, 0:H]                  # [C, H]
    b3 = p_ref[o_b3:o_b3 + C, 0:1]                   # [C, 1]

    h = jnp.dot(w1t, xt, preferred_element_type=jnp.float32) + b1
    h = jnp.maximum(h, 0.0)
    h = jnp.dot(w2t, h.astype(w2t.dtype),
                preferred_element_type=jnp.float32) + b2
    h = jnp.maximum(h, 0.0)
    o = jnp.dot(w3t, h.astype(w3t.dtype),
                preferred_element_type=jnp.float32) + b3
    o_ref[...] = o.astype(o_ref.dtype)               # lane-dense [C, TB] store


def _pack_params(params, S, H, C, dtype):
    """Pack transposed weights + column biases into one [R, L] block.

    Each piece starts at an 8-sublane-aligned row offset; lane width is
    max(S, H) (zero padded).  Returns (packed_array, row_offsets).
    """
    w1, b1, w2, b2, w3, b3 = params
    L = max(S, H)

    def pad2d(a, rows, cols):
        a = a.astype(dtype)
        return jnp.pad(a, ((0, rows - a.shape[0]), (0, cols - a.shape[1])))

    pieces, offs, off = [], [], 0
    for a in (w1.T, b1[:, None], w2.T, b2[:, None], w3.T, b3[:, None]):
        rpad = _round_up(a.shape[0], 8)
        pieces.append(pad2d(a, rpad, L))
        offs.append(off)
        off += rpad
    return jnp.concatenate(pieces, axis=0), tuple(offs)


def neural_controller(x, params, *, tile_b=2048, io_dtype=jnp.float32):
    """x: [B, state_dim] -> [B, control_dim] (float32).

    io_dtype controls the dtype of the activation / packed-parameter DMAs
    (jnp.bfloat16 halves HBM traffic on v6e/v7x); accumulation stays f32.
    """
    B, S = x.shape
    H = params[0].shape[1]
    C = params[4].shape[1]

    packed, offs = _pack_params(params, S, H, C, io_dtype)
    R, L = packed.shape

    # Batch lives in the lane (last) dim -> tiles must be 128-lane multiples.
    tile_b = max(128, _round_up(int(tile_b), 128))
    if B <= 128:
        tb = 128
    else:
        # Prefer >=2 grid steps (v7x megacore) while capping the tile size.
        half = max(128, _round_up((B + 1) // 2, 128))
        tb = min(tile_b, half)
    grid_b = pl.cdiv(B, tb)
    Bp = grid_b * tb

    xt = jnp.transpose(x).astype(io_dtype)           # [S, B] (cheap plumbing)
    if Bp != B:
        xt = jnp.pad(xt, ((0, 0), (0, Bp - B)))

    kernel = functools.partial(_mlp_kernel, S=S, H=H, C=C, offs=offs)
    itemsize = jnp.dtype(io_dtype).itemsize

    # params (x2 in case they end up double-buffered) + double-buffered
    # x^T/out^T tiles + f32 intermediates + headroom; clamped so the limit is
    # valid on every generation (v5e 16 MiB default .. v7x 64 MiB physical).
    vmem_bytes = (2 * R * L * itemsize
                  + 2 * (S * itemsize + C * 4) * tb
                  + 4 * H * tb * 4
                  + (4 << 20))
    vmem_bytes = int(min(64 << 20, max(16 << 20, vmem_bytes)))

    def build(single_buffer_params):
        pkw = {}
        if single_buffer_params:
            # Constant index_map => double-buffering the resident parameter
            # block is pure VMEM waste; keep a single buffer.
            pkw["pipeline_mode"] = pl.Buffered(1)
        return pl.pallas_call(
            kernel,
            out_shape=jax.ShapeDtypeStruct((C, Bp), jnp.float32),
            grid=(grid_b,),
            in_specs=[
                pl.BlockSpec((S, tb), lambda i: (0, i)),        # x^T tiles
                pl.BlockSpec((R, L), lambda i: (0, 0), **pkw),  # packed params
            ],
            out_specs=pl.BlockSpec((C, tb), lambda i: (0, i)),  # out^T tiles
            compiler_params=pltpu.CompilerParams(
                dimension_semantics=("parallel",),
                vmem_limit_bytes=vmem_bytes),
        )

    try:
        out_t = build(True)(xt, packed)
    except Exception:
        # Fallback if this JAX/Mosaic build rejects pl.Buffered(1) here.
        out_t = build(False)(xt, packed)

    return jnp.transpose(out_t)[:B]                  # [B, C]


def init_params(key, state_dim, hidden_dim, control_dim):
    """Synthetic nn.Linear-style params; weights stored [in, out]."""
    ks = jax.random.split(key, 6)

    def lin(kw, kb, fan_in, fan_out):
        bound = 1.0 / jnp.sqrt(fan_in)
        w = jax.random.uniform(kw, (fan_in, fan_out), jnp.float32, -bound, bound)
        b = jax.random.uniform(kb, (fan_out,), jnp.float32, -bound, bound)
        return w, b

    w1, b1 = lin(ks[0], ks[1], state_dim, hidden_dim)
    w2, b2 = lin(ks[2], ks[3], hidden_dim, hidden_dim)
    w3, b3 = lin(ks[4], ks[5], hidden_dim, control_dim)
    return (w1, b1, w2, b2, w3, b3)


def _reference(x, params):
    w1, b1, w2, b2, w3, b3 = params
    h = jnp.maximum(x @ w1 + b1, 0.0)
    h = jnp.maximum(h @ w2 + b2, 0.0)
    return h @ w3 + b3


if __name__ == "__main__":
    batch, state_dim, hidden_dim, control_dim = 8, 8, 32, 4

    key = jax.random.PRNGKey(0)
    k_x, k_p = jax.random.split(key)

    x = jax.random.normal(k_x, (batch, state_dim), jnp.float32)
    params = init_params(k_p, state_dim, hidden_dim, control_dim)

    out = neural_controller(x, params)
    out = jax.block_until_ready(out)

    ref = _reference(x, params)
    assert out.shape == (batch, control_dim)
    assert jnp.allclose(out, ref, atol=1e-5, rtol=1e-5), "mismatch vs reference"

    print("KERNEL_OK")
</pallas_src>

<mosaic_0001>
module attributes {stable_mosaic.version = 11 : i64} {
  func.func @_mlp_kernel(%arg0: i32, %arg1: memref<8x128xf32, #tpu.memory_space<vmem>>, %arg2: memref<144x32xf32, #tpu.memory_space<vmem>>, %arg3: memref<4x128xf32, #tpu.memory_space<vmem>>) attributes {dimension_semantics = [#tpu.dimension_semantics<parallel>], iteration_bounds = array<i64: 1>, scalar_prefetch = 0 : i64, scratch_operands = 0 : i64, tpu.core_type = #tpu.core_type<tc>, window_params = [{transform_indices = @transform_0, window_bounds = array<i64: 8, 128>}, {pipeline_mode = #tpu.pipeline_mode<synchronous>, transform_indices = @transform_1, window_bounds = array<i64: 144, 32>}, {transform_indices = @transform_2, window_bounds = array<i64: 4, 128>}]} {
    %c0 = arith.constant 0 : index
    %c0_0 = arith.constant 0 : index
    %0 = vector.load %arg1[%c0, %c0_0] : memref<8x128xf32, #tpu.memory_space<vmem>>, vector<8x128xf32>
    %c0_1 = arith.constant 0 : index
    %c0_2 = arith.constant 0 : index
    %1 = vector.load %arg2[%c0_1, %c0_2] : memref<144x32xf32, #tpu.memory_space<vmem>>, vector<32x8xf32>
    %c32 = arith.constant 32 : index
    %c0_3 = arith.constant 0 : index
    %2 = vector.load %arg2[%c32, %c0_3] : memref<144x32xf32, #tpu.memory_space<vmem>>, vector<32x1xf32>
    %c64 = arith.constant 64 : index
    %c0_4 = arith.constant 0 : index
    %3 = vector.load %arg2[%c64, %c0_4] : memref<144x32xf32, #tpu.memory_space<vmem>>, vector<32x32xf32>
    %c96 = arith.constant 96 : index
    %c0_5 = arith.constant 0 : index
    %4 = vector.load %arg2[%c96, %c0_5] : memref<144x32xf32, #tpu.memory_space<vmem>>, vector<32x1xf32>
    %c128 = arith.constant 128 : index
    %c0_6 = arith.constant 0 : index
    %5 = vector.load %arg2[%c128, %c0_6] : memref<144x32xf32, #tpu.memory_space<vmem>>, vector<4x32xf32>
    %c136 = arith.constant 136 : index
    %c0_7 = arith.constant 0 : index
    %6 = vector.load %arg2[%c136, %c0_7] : memref<144x32xf32, #tpu.memory_space<vmem>>, vector<4x1xf32>
    %cst = arith.constant dense<0.000000e+00> : vector<32x128xf32>
    %7 = tpu.matmul %1, %0, %cst {dimension_numbers = #tpu.dot_dimension_numbers<[1], [0], [0], [1], [0, 0, 1, 1], [], []>} : vector<32x8xf32>, vector<8x128xf32>, vector<32x128xf32> -> vector<32x128xf32>
    %8 = vector.broadcast %2 : vector<32x1xf32> to vector<32x128xf32>
    %9 = arith.addf %7, %8 : vector<32x128xf32>
    %cst_8 = arith.constant 0.000000e+00 : f32
    %10 = vector.broadcast %cst_8 : f32 to vector<32x128xf32>
    %11 = arith.maximumf %9, %10 : vector<32x128xf32>
    %cst_9 = arith.constant dense<0.000000e+00> : vector<32x128xf32>
    %12 = tpu.matmul %3, %11, %cst_9 {dimension_numbers = #tpu.dot_dimension_numbers<[1], [0], [0], [1], [0, 0, 1, 1], [], []>} : vector<32x32xf32>, vector<32x128xf32>, vector<32x128xf32> -> vector<32x128xf32>
    %13 = vector.broadcast %4 : vector<32x1xf32> to vector<32x128xf32>
    %14 = arith.addf %12, %13 : vector<32x128xf32>
    %cst_10 = arith.constant 0.000000e+00 : f32
    %15 = vector.broadcast %cst_10 : f32 to vector<32x128xf32>
    %16 = arith.maximumf %14, %15 : vector<32x128xf32>
    %cst_11 = arith.constant dense<0.000000e+00> : vector<4x128xf32>
    %17 = tpu.matmul %5, %16, %cst_11 {dimension_numbers = #tpu.dot_dimension_numbers<[1], [0], [0], [1], [0, 0, 1, 1], [], []>} : vector<4x32xf32>, vector<32x128xf32>, vector<4x128xf32> -> vector<4x128xf32>
    %18 = vector.broadcast %6 : vector<4x1xf32> to vector<4x128xf32>
    %19 = arith.addf %17, %18 : vector<4x128xf32>
    %c0_12 = arith.constant 0 : index
    %c0_13 = arith.constant 0 : index
    %20 = vector.load %arg3[%c0_12, %c0_13] : memref<4x128xf32, #tpu.memory_space<vmem>>, vector<4x128xf32>
    tpu.vector_store %arg3[%c0_12, %c0_13], %19 {strides = array<i32>} : memref<4x128xf32, #tpu.memory_space<vmem>>, vector<4x128xf32>,
    return
  }
  func.func @transform_0(%arg0: i32) -> (i32, i32) {
    %c0_i32 = arith.constant 0 : i32
    %c0_i32_0 = arith.constant 0 : i32
    return %c0_i32, %arg0 : i32, i32
  }
  func.func @transform_1(%arg0: i32) -> (i32, i32) {
    %c0_i32 = arith.constant 0 : i32
    %c0_i32_0 = arith.constant 0 : i32
    %c0_i32_1 = arith.constant 0 : i32
    return %c0_i32, %c0_i32_0 : i32, i32
  }
  func.func @transform_2(%arg0: i32) -> (i32, i32) {
    %c0_i32 = arith.constant 0 : i32
    %c0_i32_0 = arith.constant 0 : i32
    return %c0_i32, %arg0 : i32, i32
  }
}

module attributes {stable_mosaic.version = 11 : i64} {
  func.func @_mlp_kernel(%arg0: i32, %arg1: memref<8x128xf32, #tpu.memory_space<vmem>>, %arg2: memref<144x32xf32, #tpu.memory_space<vmem>>, %arg3: memref<4x128xf32, #tpu.memory_space<vmem>>) attributes {dimension_semantics = [#tpu.dimension_semantics<parallel>], iteration_bounds = array<i64: 1>, scalar_prefetch = 0 : i64, scratch_operands = 0 : i64, tpu.core_type = #tpu.core_type<tc>, window_params = [{transform_indices = @transform_0, window_bounds = array<i64: 8, 128>}, {pipeline_mode = #tpu.pipeline_mode<synchronous>, transform_indices = @transform_1, window_bounds = array<i64: 144, 32>}, {transform_indices = @transform_2, window_bounds = array<i64: 4, 128>}]} {
    %c0 = arith.constant 0 : index
    %c0_0 = arith.constant 0 : index
    %0 = vector.load %arg1[%c0, %c0_0] : memref<8x128xf32, #tpu.memory_space<vmem>>, vector<8x128xf32>
    %c0_1 = arith.constant 0 : index
    %c0_2 = arith.constant 0 : index
    %1 = vector.load %arg2[%c0_1, %c0_2] : memref<144x32xf32, #tpu.memory_space<vmem>>, vector<32x8xf32>
    %c32 = arith.constant 32 : index
    %c0_3 = arith.constant 0 : index
    %2 = vector.load %arg2[%c32, %c0_3] : memref<144x32xf32, #tpu.memory_space<vmem>>, vector<32x1xf32>
    %c64 = arith.constant 64 : index
    %c0_4 = arith.constant 0 : index
    %3 = vector.load %arg2[%c64, %c0_4] : memref<144x32xf32, #tpu.memory_space<vmem>>, vector<32x32xf32>
    %c96 = arith.constant 96 : index
    %c0_5 = arith.constant 0 : index
    %4 = vector.load %arg2[%c96, %c0_5] : memref<144x32xf32, #tpu.memory_space<vmem>>, vector<32x1xf32>
    %c128 = arith.constant 128 : index
    %c0_6 = arith.constant 0 : index
    %5 = vector.load %arg2[%c128, %c0_6] : memref<144x32xf32, #tpu.memory_space<vmem>>, vector<4x32xf32>
    %c136 = arith.constant 136 : index
    %c0_7 = arith.constant 0 : index
    %6 = vector.load %arg2[%c136, %c0_7] : memref<144x32xf32, #tpu.memory_space<vmem>>, vector<4x1xf32>
    %cst = arith.constant dense<0.000000e+00> : vector<32x128xf32>
    %7 = tpu.matmul %1, %0, %cst {dimension_numbers = #tpu.dot_dimension_numbers<[1], [0], [0], [1], [0, 0, 1, 1], [], []>} : vector<32x8xf32>, vector<8x128xf32>, vector<32x128xf32> -> vector<32x128xf32>
    %8 = vector.broadcast %2 : vector<32x1xf32> to vector<32x128xf32>
    %9 = arith.addf %7, %8 : vector<32x128xf32>
    %cst_8 = arith.constant 0.000000e+00 : f32
    %10 = vector.broadcast %cst_8 : f32 to vector<32x128xf32>
    %11 = arith.maximumf %9, %10 : vector<32x128xf32>
    %cst_9 = arith.constant dense<0.000000e+00> : vector<32x128xf32>
    %12 = tpu.matmul %3, %11, %cst_9 {dimension_numbers = #tpu.dot_dimension_numbers<[1], [0], [0], [1], [0, 0, 1, 1], [], []>} : vector<32x32xf32>, vector<32x128xf32>, vector<32x128xf32> -> vector<32x128xf32>
    %13 = vector.broadcast %4 : vector<32x1xf32> to vector<32x128xf32>
    %14 = arith.addf %12, %13 : vector<32x128xf32>
    %cst_10 = arith.constant 0.000000e+00 : f32
    %15 = vector.broadcast %cst_10 : f32 to vector<32x128xf32>
    %16 = arith.maximumf %14, %15 : vector<32x128xf32>
    %cst_11 = arith.constant dense<0.000000e+00> : vector<4x128xf32>
    %17 = tpu.matmul %5, %16, %cst_11 {dimension_numbers = #tpu.dot_dimension_numbers<[1], [0], [0], [1], [0, 0, 1, 1], [], []>} : vector<4x32xf32>, vector<32x128xf32>, vector<4x128xf32> -> vector<4x128xf32>
    %18 = vector.broadcast %6 : vector<4x1xf32> to vector<4x128xf32>
    %19 = arith.addf %17, %18 : vector<4x128xf32>
    %c0_12 = arith.constant 0 : index
    %c0_13 = arith.constant 0 : index
    %20 = vector.load %arg3[%c0_12, %c0_13] : memref<4x128xf32, #tpu.memory_space<vmem>>, vector<4x128xf32>
    tpu.vector_store %arg3[%c0_12, %c0_13], %19 {strides = array<i32>} : memref<4x128xf32, #tpu.memory_space<vmem>>, vector<4x128xf32>,
    return
  }
  func.func @transform_0(%arg0: i32) -> (i32, i32) {
    %c0_i32 = arith.constant 0 : i32
    %c0_i32_0 = arith.constant 0 : i32
    return %c0_i32, %arg0 : i32, i32
  }
  func.func @transform_1(%arg0: i32) -> (i32, i32) {
    %c0_i32 = arith.constant 0 : i32
    %c0_i32_0 = arith.constant 0 : i32
    %c0_i32_1 = arith.constant 0 : i32
    return %c0_i32, %c0_i32_0 : i32, i32
  }
  func.func @transform_2(%arg0: i32) -> (i32, i32) {
    %c0_i32 = arith.constant 0 : i32
    %c0_i32_0 = arith.constant 0 : i32
    return %c0_i32, %arg0 : i32, i32
  }
}

</mosaic_0001>

<bundles_post_ra>
// kernel: tpu_custom_call.1
= control target key start
LH: loop header
LB: loop body
LE: loop exit
PB: predicated region body
PF: predicated region fallthrough
CT: control target
= control target key end

     0   :  { %vm51_vm0 = vcmask 64512   ;;  %v456_v5 = vmov 0   ;;  %s544_s0 = inlined_call_operand.vmem [shape: f32[8,128], index: 0, kind: input, shape index: {}]   ;;  %s545_s1 = inlined_call_operand.vmem [shape: f32[144,32], index: 1, kind: input, shape index: {}]   ;;  %s546_s2 = inlined_call_operand.hbm [shape: f32[4,128], index: 2, kind: output, shape index: {}]  }
   0x1   :  { %v12_v0 = vld [vmem:[%s544_s0] sm:$0xff]  ;;  %v14_v2 = vld [vmem:[%s545_s1 + $0x8] sm:$0xff]  ;;  %v15_v3 = vld [vmem:[%s545_s1 + $0x10] sm:$0xff]  ;;  %432 = vset.pattern.permute.xlu0 %v456_v5  ;;  %433 = vset.pattern.permute.xlu1 %v456_v5 }
   0x2   :  { %v13_v1 = vld [vmem:[%s545_s1] sm:$0xff]  ;;  %395 = vmatprep.subr.mxu0 %v12_v0  ;;  %v20_v4 = vld [vmem:[%s545_s1 + $0x38] sm:$0xff]  ;;  %v18_v6 = vld [vmem:[%s545_s1 + $0x28] sm:$0xff] }
   0x3   :  { %397 = vmatprep.mubr.msk.f32.mxu0 %vm51_vm0, %v13_v1  ;;  %396 = vmatpush3.msra.mxu0 %v12_v0  ;;  %v16_v7 = vld [vmem:[%s545_s1 + $0x18] sm:$0xff]  ;;  %v19_v8 = vld [vmem:[%s545_s1 + $0x30] sm:$0xff] }
   0x4   :  { %398 = vmatmul.mubr.msk.f32.vlgmr.msra.gmra.mxu0 %vm51_vm0, %v14_v2  ;;  %48 = vperm.xlu0 %432, %v20_v4  }
   0x5   :  { %400 = vmatprep.mubr.msk.f32.mxu0 %vm51_vm0, %v15_v3 }
   0x6   :  { %7 = vsyncpa [#allocation3], 0  ;;  %38 = vperm.xlu1 %433, %v18_v6   ;;  %v17_v9 = vld [vmem:[%s545_s1 + $0x20] sm:$0xff]  ;;  %v28_v10 = vld [vmem:[%s545_s1 + $0x78] sm:$0xff]  ;;  %vm173_vm1 = vcmask 261120   ;;  %v457_v35 = vmov 0.0  }
   0x7   :  { %v27_v11 = vld [vmem:[%s545_s1 + $0x70] sm:$0xff]  ;;  %v26_v12 = vld [vmem:[%s545_s1 + $0x68] sm:$0xff]  ;;  %v25_v13 = vld [vmem:[%s545_s1 + $0x60] sm:$0xff]  ;;  %417 = vmatprep.subr.mxu0 %v457_v35  ;;  %vm458_vm2 = vmmov 0   ;;  %s459_s18 = smov [#allocation2]  }
   0x8   :  { %401 = vmatmul.mubr.msk.f32.gmra.mxu0 %vm51_vm0, %v16_v7  ;;  %43 = vperm.xlu0 %432, %v19_v8   ;;  %v30_v14 = vld [vmem:[%s545_s1 + $0x88] sm:$0xf]  ;;  %v21_v15 = vld [vmem:[%s545_s1 + $0x40] sm:$0xff]  ;;  %v23_v33 = vld [vmem:[%s545_s1 + $0x50] sm:$0xff]  ;;  %s360_s0 = sshll.u32 %s459_s18, 4  ;;  %s361_s0 = int_to_ptr.vmem [resolvable:$true] %s360_s0 }
   0x9   :  { %411 = vmatprep.mubr.msk.f32.mxu1 %vm173_vm1, %v21_v15  ;;  %v22_v32 = vld [vmem:[%s545_s1 + $0x48] sm:$0xff]  ;;  %v24_v34 = vld [vmem:[%s545_s1 + $0x58] sm:$0xff]  ;;  %425 = vmatprep.mubr.msk.f32.mxu0 %vm458_vm2, %v457_v35  ;;  %v29_v52 = vld [vmem:[%s545_s1 + $0x80] sm:$0xf]  ;;  %s434_s19 = scalar_lea.vmem %s361_s0, 64  ;;  %p439_p1 = scmp.lt.s32.totalorder %s361_s0, %s361_s0 }
   0xa   :  { %33 = vperm.xlu1 %433, %v17_v9   ;;  %p435_p0 = scmp.ne.s32.totalorder %s361_s0, %s434_s19  ;;  %p440_p2 = scmp.lt.s32.totalorder %s434_s19, %s434_s19 }
   0xc   :  { %170 = vperm.xlu0 %432, %v28_v10   ;;  %p441_p3 = por %p440_p2, %p439_p1 }
   0xe   :  { %165 = vperm.xlu1 %433, %v27_v11   ;;  %p442_p4 = pnand %p441_p3, %p435_p0 }
  0x10   :  { %160 = vperm.xlu0 %432, %v26_v12  }
  0x12   :  { %155 = vperm.xlu1 %433, %v25_v13  }
  0x14   :  { %277 = vperm.xlu0 %432, %v30_v14  }
  0x7f   :  { %v49_v16 = vpop.permute.xlu0 %48 }
  0x81   :  { %v39_v18 = vpop.permute.xlu1 %38 }
  0x83   :  { %v44_v22 = vpop.permute.xlu0 %43 }
  0x85   :  { %v34_v27 = vpop.permute.xlu1 %33 }
  0x87   :  { %v171_v36 = vpop.permute.xlu0 %170 }
  0x89   :  { %v166_v38 = vpop.permute.xlu1 %165 }
  0x8b   :  { %v161_v42 = vpop.permute.xlu0 %160 }
  0x8d   :  { %v156_v47 = vpop.permute.xlu1 %155 }
  0x8f   :  { %v278_v53 = vpop.permute.xlu0 %277 }
  0xc4   :  { %v399_v17 = vpop.f32.mrf.mxu0 }
  0xc5   :  { %v136_v24 = vadd.f32 %v399_v17, %v39_v18 }
  0xc6   :  { %v130_v19 = vpop.f32.mrf.mxu0 }
  0xc7   :  { %v131_v28 = vadd.f32 %v130_v19, %v34_v27  ;;  %v150_v30 = vmax.f32 %v136_v24, 0.0 }
  0xc8   :  { %v402_v20 = vpop.f32.mrf.mxu0 }
  0xc9   :  { %v146_v21 = vadd.f32 %v402_v20, %v49_v16  ;;  %v149_v31 = vmax.f32 %v131_v28, 0.0 }
  0xca   :  { %v140_v23 = vpop.f32.mrf.mxu0 }
  0xcb   :  { %v152_v25 = vmax.f32 %v146_v21, 0.0  ;;  %v141_v26 = vadd.f32 %v140_v23, %v44_v22 }
  0xcd   :  { %v151_v29 = vmax.f32 %v141_v26, 0.0  ;;  %403 = vmatprep.subr.mxu1 %v152_v25 }
  0xce   :  { %404 = vmatpush3.msra.mxu1 %v152_v25 }
  0xcf   :  { %405 = vmatprep.subr.mxu1 %v151_v29 }
  0xd0   :  { %406 = vmatpush3.msra.mxu1 %v151_v29 }
  0xd1   :  { %407 = vmatprep.subr.mxu1 %v150_v30 }
  0xd2   :  { %408 = vmatpush3.msra.mxu1 %v150_v30 }
  0xd3   :  { %409 = vmatprep.subr.mxu1 %v149_v31 }
  0xd4   :  { %410 = vmatpush3.msra.mxu1 %v149_v31 }
  0xd5   :  { %412 = vmatmul.mubr.msk.f32.vlgmr.msra.gmra.mxu1 %vm173_vm1, %v22_v32 }
  0xd6   :  { %414 = vmatprep.mubr.msk.f32.mxu1 %vm173_vm1, %v23_v33 }
  0xd9   :  { %415 = vmatmul.mubr.msk.f32.gmra.mxu1 %vm173_vm1, %v24_v34 }
 0x195   :  { %v413_v37 = vpop.f32.mrf.mxu1 }
 0x196   :  { %v258_v44 = vadd.f32 %v413_v37, %v161_v42 }
 0x197   :  { %v252_v39 = vpop.f32.mrf.mxu1 }
 0x198   :  { %v253_v48 = vadd.f32 %v252_v39, %v156_v47  ;;  %v272_v50 = vmax.f32 %v258_v44, 0.0 }
 0x199   :  { %v416_v40 = vpop.f32.mrf.mxu1 }
 0x19a   :  { %v268_v41 = vadd.f32 %v416_v40, %v171_v36  ;;  %v271_v51 = vmax.f32 %v253_v48, 0.0 }
 0x19b   :  { %v262_v43 = vpop.f32.mrf.mxu1 }
 0x19c   :  { %v274_v45 = vmax.f32 %v268_v41, 0.0  ;;  %v263_v46 = vadd.f32 %v262_v43, %v166_v38 }
 0x19e   :  { %v273_v49 = vmax.f32 %v263_v46, 0.0  ;;  %418 = vmatpush3.msra.mxu0 %v274_v45 }
 0x19f   :  { %419 = vmatprep.subr.mxu0 %v457_v35 }
 0x1a0   :  { %420 = vmatpush3.msra.mxu0 %v273_v49 }
 0x1a1   :  { %421 = vmatprep.subr.mxu0 %v457_v35 }
 0x1a2   :  { %422 = vmatpush3.msra.mxu0 %v272_v50 }
 0x1a3   :  { %423 = vmatprep.subr.mxu0 %v457_v35 }
 0x1a4   :  { %424 = vmatpush3.msra.mxu0 %v271_v51 }
 0x1a5   :  { %426 = vmatmul.mubr.msk.f32.vlgmr.msra.gmra.mxu0 %vm173_vm1, %v29_v52 }
 0x265   :  { %v349_v54 = vpop.f32.mrf.mxu0 }
 0x266   :  { %v350_v55 = vadd.f32 %v349_v54, %v278_v53 }
 0x267   :  { %v427_v56 = vpop.f32.mrf.mxu0 }
 0x268   :  { %353 = vst [vmem:[#allocation2] sm:$0xf] %v350_v55 }
 0x269   :  { %445 = shalt.err (!%p442_p4)
}
 0x26a   :  { %363 = dma.vmem_to_hbm [thread:$0]  %s361_s0, 64, %s546_s2, [#allocation3]  }
 0x26b   :  { %454 = dma.done.wait [#allocation3], 64  }
 0x26c   :  { %455 = vsyncadd [#allocation3], 4294967232 }
 0x26d   :  { %367 = vsyncpa [#allocation3], 1 }

// kernel: tpu_custom_call.1
= control target key start
LH: loop header
LB: loop body
LE: loop exit
PB: predicated region body
PF: predicated region fallthrough
CT: control target
= control target key end

     0   :  { %vm51_vm0 = vcmask 64512   ;;  %v456_v5 = vmov 0   ;;  %s544_s0 = inlined_call_operand.vmem [shape: f32[8,128], index: 0, kind: input, shape index: {}]   ;;  %s545_s1 = inlined_call_operand.vmem [shape: f32[144,32], index: 1, kind: input, shape index: {}]   ;;  %s546_s2 = inlined_call_operand.hbm [shape: f32[4,128], index: 2, kind: output, shape index: {}]  }
   0x1   :  { %v12_v0 = vld [vmem:[%s544_s0] sm:$0xff]  ;;  %v14_v2 = vld [vmem:[%s545_s1 + $0x8] sm:$0xff]  ;;  %v15_v3 = vld [vmem:[%s545_s1 + $0x10] sm:$0xff]  ;;  %432 = vset.pattern.permute.xlu0 %v456_v5  ;;  %433 = vset.pattern.permute.xlu1 %v456_v5 }
   0x2   :  { %v13_v1 = vld [vmem:[%s545_s1] sm:$0xff]  ;;  %395 = vmatprep.subr.mxu0 %v12_v0  ;;  %v20_v4 = vld [vmem:[%s545_s1 + $0x38] sm:$0xff]  ;;  %v18_v6 = vld [vmem:[%s545_s1 + $0x28] sm:$0xff] }
   0x3   :  { %397 = vmatprep.mubr.msk.f32.mxu0 %vm51_vm0, %v13_v1  ;;  %396 = vmatpush3.msra.mxu0 %v12_v0  ;;  %v16_v7 = vld [vmem:[%s545_s1 + $0x18] sm:$0xff]  ;;  %v19_v8 = vld [vmem:[%s545_s1 + $0x30] sm:$0xff] }
   0x4   :  { %398 = vmatmul.mubr.msk.f32.vlgmr.msra.gmra.mxu0 %vm51_vm0, %v14_v2  ;;  %48 = vperm.xlu0 %432, %v20_v4  }
   0x5   :  { %400 = vmatprep.mubr.msk.f32.mxu0 %vm51_vm0, %v15_v3 }
   0x6   :  { %7 = vsyncpa [#allocation3], 0  ;;  %38 = vperm.xlu1 %433, %v18_v6   ;;  %v17_v9 = vld [vmem:[%s545_s1 + $0x20] sm:$0xff]  ;;  %v28_v10 = vld [vmem:[%s545_s1 + $0x78] sm:$0xff]  ;;  %vm173_vm1 = vcmask 261120   ;;  %v457_v35 = vmov 0.0  }
   0x7   :  { %v27_v11 = vld [vmem:[%s545_s1 + $0x70] sm:$0xff]  ;;  %v26_v12 = vld [vmem:[%s545_s1 + $0x68] sm:$0xff]  ;;  %v25_v13 = vld [vmem:[%s545_s1 + $0x60] sm:$0xff]  ;;  %417 = vmatprep.subr.mxu0 %v457_v35  ;;  %vm458_vm2 = vmmov 0   ;;  %s459_s18 = smov [#allocation2]  }
   0x8   :  { %401 = vmatmul.mubr.msk.f32.gmra.mxu0 %vm51_vm0, %v16_v7  ;;  %43 = vperm.xlu0 %432, %v19_v8   ;;  %v30_v14 = vld [vmem:[%s545_s1 + $0x88] sm:$0xf]  ;;  %v21_v15 = vld [vmem:[%s545_s1 + $0x40] sm:$0xff]  ;;  %v23_v33 = vld [vmem:[%s545_s1 + $0x50] sm:$0xff]  ;;  %s360_s0 = sshll.u32 %s459_s18, 4  ;;  %s361_s0 = int_to_ptr.vmem [resolvable:$true] %s360_s0 }
   0x9   :  { %411 = vmatprep.mubr.msk.f32.mxu1 %vm173_vm1, %v21_v15  ;;  %v22_v32 = vld [vmem:[%s545_s1 + $0x48] sm:$0xff]  ;;  %v24_v34 = vld [vmem:[%s545_s1 + $0x58] sm:$0xff]  ;;  %425 = vmatprep.mubr.msk.f32.mxu0 %vm458_vm2, %v457_v35  ;;  %v29_v52 = vld [vmem:[%s545_s1 + $0x80] sm:$0xf]  ;;  %s434_s19 = scalar_lea.vmem %s361_s0, 64  ;;  %p439_p1 = scmp.lt.s32.totalorder %s361_s0, %s361_s0 }
   0xa   :  { %33 = vperm.xlu1 %433, %v17_v9   ;;  %p435_p0 = scmp.ne.s32.totalorder %s361_s0, %s434_s19  ;;  %p440_p2 = scmp.lt.s32.totalorder %s434_s19, %s434_s19 }
   0xc   :  { %170 = vperm.xlu0 %432, %v28_v10   ;;  %p441_p3 = por %p440_p2, %p439_p1 }
   0xe   :  { %165 = vperm.xlu1 %433, %v27_v11   ;;  %p442_p4 = pnand %p441_p3, %p435_p0 }
  0x10   :  { %160 = vperm.xlu0 %432, %v26_v12  }
  0x12   :  { %155 = vperm.xlu1 %433, %v25_v13  }
  0x14   :  { %277 = vperm.xlu0 %432, %v30_v14  }
  0x7f   :  { %v49_v16 = vpop.permute.xlu0 %48 }
  0x81   :  { %v39_v18 = vpop.permute.xlu1 %38 }
  0x83   :  { %v44_v22 = vpop.permute.xlu0 %43 }
  0x85   :  { %v34_v27 = vpop.permute.xlu1 %33 }
  0x87   :  { %v171_v36 = vpop.permute.xlu0 %170 }
  0x89   :  { %v166_v38 = vpop.permute.xlu1 %165 }
  0x8b   :  { %v161_v42 = vpop.permute.xlu0 %160 }
  0x8d   :  { %v156_v47 = vpop.permute.xlu1 %155 }
  0x8f   :  { %v278_v53 = vpop.permute.xlu0 %277 }
  0xc4   :  { %v399_v17 = vpop.f32.mrf.mxu0 }
  0xc5   :  { %v136_v24 = vadd.f32 %v399_v17, %v39_v18 }
  0xc6   :  { %v130_v19 = vpop.f32.mrf.mxu0 }
  0xc7   :  { %v131_v28 = vadd.f32 %v130_v19, %v34_v27  ;;  %v150_v30 = vmax.f32 %v136_v24, 0.0 }
  0xc8   :  { %v402_v20 = vpop.f32.mrf.mxu0 }
  0xc9   :  { %v146_v21 = vadd.f32 %v402_v20, %v49_v16  ;;  %v149_v31 = vmax.f32 %v131_v28, 0.0 }
  0xca   :  { %v140_v23 = vpop.f32.mrf.mxu0 }
  0xcb   :  { %v152_v25 = vmax.f32 %v146_v21, 0.0  ;;  %v141_v26 = vadd.f32 %v140_v23, %v44_v22 }
  0xcd   :  { %v151_v29 = vmax.f32 %v141_v26, 0.0  ;;  %403 = vmatprep.subr.mxu1 %v152_v25 }
  0xce   :  { %404 = vmatpush3.msra.mxu1 %v152_v25 }
  0xcf   :  { %405 = vmatprep.subr.mxu1 %v151_v29 }
  0xd0   :  { %406 = vmatpush3.msra.mxu1 %v151_v29 }
  0xd1   :  { %407 = vmatprep.subr.mxu1 %v150_v30 }
  0xd2   :  { %408 = vmatpush3.msra.mxu1 %v150_v30 }
  0xd3   :  { %409 = vmatprep.subr.mxu1 %v149_v31 }
  0xd4   :  { %410 = vmatpush3.msra.mxu1 %v149_v31 }
  0xd5   :  { %412 = vmatmul.mubr.msk.f32.vlgmr.msra.gmra.mxu1 %vm173_vm1, %v22_v32 }
  0xd6   :  { %414 = vmatprep.mubr.msk.f32.mxu1 %vm173_vm1, %v23_v33 }
  0xd9   :  { %415 = vmatmul.mubr.msk.f32.gmra.mxu1 %vm173_vm1, %v24_v34 }
 0x195   :  { %v413_v37 = vpop.f32.mrf.mxu1 }
 0x196   :  { %v258_v44 = vadd.f32 %v413_v37, %v161_v42 }
 0x197   :  { %v252_v39 = vpop.f32.mrf.mxu1 }
 0x198   :  { %v253_v48 = vadd.f32 %v252_v39, %v156_v47  ;;  %v272_v50 = vmax.f32 %v258_v44, 0.0 }
 0x199   :  { %v416_v40 = vpop.f32.mrf.mxu1 }
 0x19a   :  { %v268_v41 = vadd.f32 %v416_v40, %v171_v36  ;;  %v271_v51 = vmax.f32 %v253_v48, 0.0 }
 0x19b   :  { %v262_v43 = vpop.f32.mrf.mxu1 }
 0x19c   :  { %v274_v45 = vmax.f32 %v268_v41, 0.0  ;;  %v263_v46 = vadd.f32 %v262_v43, %v166_v38 }
 0x19e   :  { %v273_v49 = vmax.f32 %v263_v46, 0.0  ;;  %418 = vmatpush3.msra.mxu0 %v274_v45 }
 0x19f   :  { %419 = vmatprep.subr.mxu0 %v457_v35 }
 0x1a0   :  { %420 = vmatpush3.msra.mxu0 %v273_v49 }
 0x1a1   :  { %421 = vmatprep.subr.mxu0 %v457_v35 }
 0x1a2   :  { %422 = vmatpush3.msra.mxu0 %v272_v50 }
 0x1a3   :  { %423 = vmatprep.subr.mxu0 %v457_v35 }
 0x1a4   :  { %424 = vmatpush3.msra.mxu0 %v271_v51 }
 0x1a5   :  { %426 = vmatmul.mubr.msk.f32.vlgmr.msra.gmra.mxu0 %vm173_vm1, %v29_v52 }
 0x265   :  { %v349_v54 = vpop.f32.mrf.mxu0 }
 0x266   :  { %v350_v55 = vadd.f32 %v349_v54, %v278_v53 }
 0x267   :  { %v427_v56 = vpop.f32.mrf.mxu0 }
 0x268   :  { %353 = vst [vmem:[#allocation2] sm:$0xf] %v350_v55 }
 0x269   :  { %445 = shalt.err (!%p442_p4)
}
 0x26a   :  { %363 = dma.vmem_to_hbm [thread:$0]  %s361_s0, 64, %s546_s2, [#allocation3]  }
 0x26b   :  { %454 = dma.done.wait [#allocation3], 64  }
 0x26c   :  { %455 = vsyncadd [#allocation3], 4294967232 }
 0x26d   :  { %367 = vsyncpa [#allocation3], 1 }

</bundles_post_ra>
